<compile_context>
chip_gen: v5e
topology: v5e:2x2
jax: 0.10.0
libtpu: 0.0.40
codegen_flags: <defaults>
</compile_context>

<pallas_src>
import functools

import jax
import jax.numpy as jnp
from jax import lax
from jax.experimental import pallas as pl
from jax.experimental.pallas import tpu as pltpu


NBUF = 4  # gathered-row prefetch depth (>2 so the small row DMA latency hides)


def _row_tile(r, cap=1024):
    """Rows of the (N/128, 128) view handled per grid step.

    Prefers >= 2 tiles (v7x megacore) with TS a multiple of 8; falls back to a
    single full-extent tile (always a legal block shape) for tiny graphs.
    """
    if r % 16 != 0:
        return r
    ts = min(cap, r // 2)
    ts -= ts % 8
    while r % ts:
        ts -= 8
    return ts


def _budget_score_kernel(ids_ref, cnt_ref, adj_ref, bold_ref, mask_ref,
                         bnew_ref, score_ref, rows_ref, sems):
    # grid = (N//(TS*128),): one column tile per step ("parallel").
    ts = bold_ref.shape[0]
    col0 = pl.multiple_of(pl.program_id(0) * ts, ts)
    count = cnt_ref[0]               # number of valid picked rows (SMEM scalar)
    nbuf = rows_ref.shape[0]

    def row_copy(k, slot):
        # adj[ids[k], col0:col0+ts, :]  ->  rows_ref[slot]   (contiguous slab)
        return pltpu.make_async_copy(
            adj_ref.at[ids_ref[k], pl.ds(col0, ts), :],
            rows_ref.at[slot],
            sems.at[slot])

    # Prime the prefetch pipeline (up to nbuf-1 gathered rows in flight).
    for s in range(nbuf - 1):
        @pl.when(s < count)
        def _(s=s):
            row_copy(s, s).start()

    # updateBdgt: budget[tile] += adj[ids[k], tile] for the valid rows only.
    bnew_ref[...] = bold_ref[...]

    @pl.loop(0, count)
    def _(k):
        kp = k + (nbuf - 1)

        @pl.when(kp < count)
        def _():
            row_copy(kp, kp % nbuf).start()

        slot = k % nbuf
        row_copy(k, slot).wait()
        bnew_ref[...] += rows_ref[slot].astype(jnp.float32)

    # sample() prep: score = (mask * budget)^2 for this column tile.
    score_ref[...] = (mask_ref[...] * bnew_ref[...]) ** 2


def _budget_and_score(ids, cnt, adj3, budget2, mask2):
    """budget_new = budget + sum_{k<cnt} adj[ids[k]];  score = (mask*budget_new)^2.

    adj3:    (N, N/128, 128) adjacency view (any float dtype; cast in-kernel)
    budget2: (N/128, 128) f32,   mask2: (N/128, 128) f32
    """
    r, lanes = budget2.shape
    assert lanes == 128
    ts = _row_tile(r)
    grid = (r // ts,)

    return pl.pallas_call(
        _budget_score_kernel,
        out_shape=(
            jax.ShapeDtypeStruct((r, 128), jnp.float32),   # updated budget
            jax.ShapeDtypeStruct((r, 128), jnp.float32),   # score
        ),
        grid_spec=pltpu.PrefetchScalarGridSpec(
            num_scalar_prefetch=2,      # ids, valid-count -> SMEM
            grid=grid,
            in_specs=[
                pl.BlockSpec(memory_space=pl.ANY),                    # adj (HBM)
                pl.BlockSpec((ts, 128), lambda j, ids, cnt: (j, 0)),  # old budget
                pl.BlockSpec((ts, 128), lambda j, ids, cnt: (j, 0)),  # mask
            ],
            out_specs=[
                pl.BlockSpec((ts, 128), lambda j, ids, cnt: (j, 0)),  # new budget
                pl.BlockSpec((ts, 128), lambda j, ids, cnt: (j, 0)),  # score
            ],
            scratch_shapes=[
                pltpu.VMEM((NBUF, ts, 128), adj3.dtype),   # gathered-row buffers
                pltpu.SemaphoreType.DMA((NBUF,)),
            ]),
        compiler_params=pltpu.CompilerParams(
            dimension_semantics=("parallel",),
            vmem_limit_bytes=32 * 1024 * 1024),
    )(ids, cnt, adj3, budget2, mask2)


# ----------------------------- host-side glue -------------------------------

def _weighted_sample(score, samp_num, key):
    """Mirrors sample(): np.random.choice(p=score/norm, replace=False) semantics.

    Positive-score nodes are drawn without replacement with p ~ score
    (Gumbel-top-k).  If fewer than samp_num scores are positive, all positive
    nodes are taken and the remaining slots are filled uniformly (without
    replacement) from zero-score nodes, matching the posNum < sampNum branch.
    If no score is positive (norm == 0) a single uniform node is valid.
    """
    kg, ku = jax.random.split(key)
    pos = score > 0.0
    pos_num = jnp.sum(pos.astype(jnp.int32))
    g = jax.random.gumbel(kg, score.shape, dtype=jnp.float32)
    u = jax.random.uniform(ku, score.shape, dtype=jnp.float32)

    pos_rank = jnp.where(pos, jnp.log(jnp.maximum(score, 1e-30)) + g, -jnp.inf)
    _, cand_pos = lax.top_k(pos_rank, samp_num)
    fill_rank = jnp.where(pos, -jnp.inf, u)           # uniform rank over zeros
    _, cand_fill = lax.top_k(fill_rank, samp_num)

    idx = jnp.arange(samp_num, dtype=jnp.int32)
    fill_slot = jnp.clip(idx - pos_num, 0, samp_num - 1)
    cand = jnp.where(idx < pos_num, cand_pos, cand_fill[fill_slot])
    num_valid = jnp.where(pos_num > 0, samp_num, 1).astype(jnp.int32)
    return cand.astype(jnp.int32), num_valid


@functools.partial(jax.jit, static_argnames=("samp_num",))
def _depth_step(adj3, budget2, mask2, ids, cnt, key, *, samp_num):
    """One sampDepth iteration: budget += gathered rows, sample, update mask."""
    budget2, score2 = _budget_and_score(ids, cnt, adj3, budget2, mask2)
    cand, num_valid = _weighted_sample(score2.reshape(-1), samp_num, key)
    # nodeMask = nodeMask * makeMask(newNodes): zero out the valid candidates.
    picked = (jnp.arange(samp_num, dtype=jnp.int32) < num_valid).astype(jnp.float32)
    keep = jnp.ones((mask2.size,), jnp.float32).at[cand].min(1.0 - picked)
    mask2 = mask2 * keep.reshape(mask2.shape)
    return budget2, mask2, cand, jnp.reshape(num_valid, (1,))


def sample_large_graph(adj, pick_nodes, key, samp_depth=2, samp_num=20000):
    """Mirrors sampleLargeGraph.forward(graph_adj, pickNodes, sampDepth, sampNum)."""
    n = adj.shape[0]
    if n % 128 != 0:
        raise ValueError("number of nodes must be a multiple of 128")
    samp_num = int(min(samp_num, n))          # static under jit
    r = n // 128

    # Sublane/lane-dense views: vectors (N/128, 128); adjacency (N, N/128, 128).
    # TODO(synk): for very large graphs store adj as int8/bf16 (2-4x less HBM
    # traffic and capacity, biggest win on v5e); the kernel already casts to f32.
    adj3 = adj.reshape(n, r, 128)
    mask2 = jnp.ones((n,), jnp.float32).at[jnp.asarray(pick_nodes)].set(0.0)
    mask2 = mask2.reshape(r, 128)
    budget2 = jnp.zeros((r, 128), jnp.float32)
    ids = jnp.asarray(pick_nodes, jnp.int32)
    cnt = jnp.array([ids.shape[0]], jnp.int32)

    for i in range(samp_depth):               # samp_depth is tiny and static
        key, sub = jax.random.split(key)
        budget2, mask2, cand, cnt_next = _depth_step(
            adj3, budget2, mask2, ids, cnt, sub, samp_num=samp_num)
        if i == samp_depth - 1:
            break
        ids, cnt = cand, cnt_next

    # np.argwhere(nodeMask == 0): dynamic shape -> single host sync at the end.
    return jnp.nonzero(mask2.reshape(-1) == 0.0)[0]


if __name__ == "__main__":
    key = jax.random.PRNGKey(0)
    n = 256
    k_adj, k_pick, k_samp = jax.random.split(key, 3)

    # Random sparse-ish symmetric 0/1 adjacency (dense float32 for the kernel).
    a = (jax.random.uniform(k_adj, (n, n)) < 0.05).astype(jnp.float32)
    adj = jnp.maximum(a, a.T)

    # Initial picked nodes (analogous to the training seed nodes).
    pick_nodes = jax.random.choice(k_pick, n, (16,), replace=False)

    # Kernel correctness check against a pure-JAX reference for one step.
    r = n // 128
    adj3 = adj.reshape(n, r, 128)
    ids0 = pick_nodes.astype(jnp.int32)
    cnt0 = jnp.array([ids0.shape[0]], jnp.int32)
    mask0 = jnp.ones((n,), jnp.float32).at[ids0].set(0.0).reshape(r, 128)
    b_k, s_k = _budget_and_score(ids0, cnt0, adj3,
                                 jnp.zeros((r, 128), jnp.float32), mask0)
    b_ref = jnp.sum(adj[ids0], axis=0).reshape(r, 128)
    s_ref = (mask0 * b_ref) ** 2
    assert bool(jnp.allclose(b_k, b_ref, atol=1e-5)), "budget mismatch"
    assert bool(jnp.allclose(s_k, s_ref, atol=1e-5)), "score mismatch"

    # Valid-count guard: only the first cnt rows must be gathered.
    cnt_half = jnp.array([8], jnp.int32)
    b_h, _ = _budget_and_score(ids0, cnt_half, adj3,
                               jnp.zeros((r, 128), jnp.float32), mask0)
    b_h_ref = jnp.sum(adj[ids0[:8]], axis=0).reshape(r, 128)
    assert bool(jnp.allclose(b_h, b_h_ref, atol=1e-5)), "count-guard mismatch"

    pck = sample_large_graph(adj, pick_nodes, k_samp, samp_depth=2, samp_num=32)
    jax.block_until_ready(pck)
    assert pck.ndim == 1 and int(pck.shape[0]) >= int(pick_nodes.shape[0])
    print("KERNEL_OK")
</pallas_src>

<mosaic_0001>
module attributes {stable_mosaic.version = 11 : i64} {
  func.func @_budget_score_kernel(%arg0: i32, %arg1: memref<16xi32, #tpu.memory_space<smem>>, %arg2: memref<1xi32, #tpu.memory_space<smem>>, %arg3: memref<256x2x128xf32, #tpu.memory_space<any>>, %arg4: memref<2x128xf32, #tpu.memory_space<vmem>>, %arg5: memref<2x128xf32, #tpu.memory_space<vmem>>, %arg6: memref<2x128xf32, #tpu.memory_space<vmem>>, %arg7: memref<2x128xf32, #tpu.memory_space<vmem>>, %arg8: memref<4x2x128xf32, #tpu.memory_space<vmem>>, %arg9: memref<4x!tpu.dma_semaphore, #tpu.memory_space<semaphore_mem>>) attributes {dimension_semantics = [#tpu.dimension_semantics<parallel>], iteration_bounds = array<i64: 1>, scalar_prefetch = 2 : i64, scratch_operands = 2 : i64, tpu.core_type = #tpu.core_type<tc>, window_params = [{}, {transform_indices = @transform_1, window_bounds = array<i64: 2, 128>}, {transform_indices = @transform_2, window_bounds = array<i64: 2, 128>}, {transform_indices = @transform_3, window_bounds = array<i64: 2, 128>}, {transform_indices = @transform_4, window_bounds = array<i64: 2, 128>}]} {
    %c2_i32 = arith.constant 2 : i32
    %0 = arith.muli %arg0, %c2_i32 : i32
    %1 = tpu.assume_multiple %0, 2 : i32
    %c0 = arith.constant 0 : index
    %2 = memref.load %arg2[%c0] : memref<1xi32, #tpu.memory_space<smem>>
    %c0_i32 = arith.constant 0 : i32
    %3 = arith.cmpi sgt, %2, %c0_i32 : i32
    %4 = arith.extui %3 : i1 to i32
    %c0_i32_0 = arith.constant 0 : i32
    %5 = arith.cmpi ne, %4, %c0_i32_0 : i32
    scf.if %5 {
      %c0_22 = arith.constant 0 : index
      %25 = memref.load %arg1[%c0_22] : memref<16xi32, #tpu.memory_space<smem>>
      %c0_i32_23 = arith.constant 0 : i32
      %c0_i32_24 = arith.constant 0 : i32
      %c0_i32_25 = arith.constant 0 : i32
      %26 = tpu.memref_slice %arg3[%25, %1, %c0_i32_25] : memref<256x2x128xf32, #tpu.memory_space<any>> -> memref<1x2x128xf32, #tpu.memory_space<any>>
      %27 = tpu.memref_squeeze %26 : memref<1x2x128xf32, #tpu.memory_space<any>> -> memref<2x128xf32, #tpu.memory_space<any>>
      %c0_i32_26 = arith.constant 0 : i32
      %c0_i32_27 = arith.constant 0 : i32
      %28 = tpu.memref_slice %arg8[%c0_i32_23, %c0_i32_26, %c0_i32_27] : memref<4x2x128xf32, #tpu.memory_space<vmem>> -> memref<1x2x128xf32, #tpu.memory_space<vmem>>
      %29 = tpu.memref_squeeze %28 : memref<1x2x128xf32, #tpu.memory_space<vmem>> -> memref<2x128xf32, #tpu.memory_space<vmem>>
      %30 = tpu.memref_slice %arg9[%c0_i32_24] : memref<4x!tpu.dma_semaphore, #tpu.memory_space<semaphore_mem>> -> memref<1x!tpu.dma_semaphore, #tpu.memory_space<semaphore_mem>>
      %31 = tpu.memref_squeeze %30 : memref<1x!tpu.dma_semaphore, #tpu.memory_space<semaphore_mem>> -> memref<!tpu.dma_semaphore, #tpu.memory_space<semaphore_mem>>
      tpu.enqueue_dma source(%27 : memref<2x128xf32, #tpu.memory_space<any>>) target(%29 : memref<2x128xf32, #tpu.memory_space<vmem>>) target_semaphore(%31 : memref<!tpu.dma_semaphore, #tpu.memory_space<semaphore_mem>>)
    } else {
    }
    %c1_i32 = arith.constant 1 : i32
    %6 = arith.cmpi sgt, %2, %c1_i32 : i32
    %7 = arith.extui %6 : i1 to i32
    %c0_i32_1 = arith.constant 0 : i32
    %8 = arith.cmpi ne, %7, %c0_i32_1 : i32
    scf.if %8 {
      %c1 = arith.constant 1 : index
      %25 = memref.load %arg1[%c1] : memref<16xi32, #tpu.memory_space<smem>>
      %c1_i32_22 = arith.constant 1 : i32
      %c1_i32_23 = arith.constant 1 : i32
      %c0_i32_24 = arith.constant 0 : i32
      %26 = tpu.memref_slice %arg3[%25, %1, %c0_i32_24] : memref<256x2x128xf32, #tpu.memory_space<any>> -> memref<1x2x128xf32, #tpu.memory_space<any>>
      %27 = tpu.memref_squeeze %26 : memref<1x2x128xf32, #tpu.memory_space<any>> -> memref<2x128xf32, #tpu.memory_space<any>>
      %c0_i32_25 = arith.constant 0 : i32
      %c0_i32_26 = arith.constant 0 : i32
      %28 = tpu.memref_slice %arg8[%c1_i32_22, %c0_i32_25, %c0_i32_26] : memref<4x2x128xf32, #tpu.memory_space<vmem>> -> memref<1x2x128xf32, #tpu.memory_space<vmem>>
      %29 = tpu.memref_squeeze %28 : memref<1x2x128xf32, #tpu.memory_space<vmem>> -> memref<2x128xf32, #tpu.memory_space<vmem>>
      %30 = tpu.memref_slice %arg9[%c1_i32_23] : memref<4x!tpu.dma_semaphore, #tpu.memory_space<semaphore_mem>> -> memref<1x!tpu.dma_semaphore, #tpu.memory_space<semaphore_mem>>
      %31 = tpu.memref_squeeze %30 : memref<1x!tpu.dma_semaphore, #tpu.memory_space<semaphore_mem>> -> memref<!tpu.dma_semaphore, #tpu.memory_space<semaphore_mem>>
      tpu.enqueue_dma source(%27 : memref<2x128xf32, #tpu.memory_space<any>>) target(%29 : memref<2x128xf32, #tpu.memory_space<vmem>>) target_semaphore(%31 : memref<!tpu.dma_semaphore, #tpu.memory_space<semaphore_mem>>)
    } else {
    }
    %c2_i32_2 = arith.constant 2 : i32
    %9 = arith.cmpi sgt, %2, %c2_i32_2 : i32
    %10 = arith.extui %9 : i1 to i32
    %c0_i32_3 = arith.constant 0 : i32
    %11 = arith.cmpi ne, %10, %c0_i32_3 : i32
    scf.if %11 {
      %c2 = arith.constant 2 : index
      %25 = memref.load %arg1[%c2] : memref<16xi32, #tpu.memory_space<smem>>
      %c2_i32_22 = arith.constant 2 : i32
      %c2_i32_23 = arith.constant 2 : i32
      %c0_i32_24 = arith.constant 0 : i32
      %26 = tpu.memref_slice %arg3[%25, %1, %c0_i32_24] : memref<256x2x128xf32, #tpu.memory_space<any>> -> memref<1x2x128xf32, #tpu.memory_space<any>>
      %27 = tpu.memref_squeeze %26 : memref<1x2x128xf32, #tpu.memory_space<any>> -> memref<2x128xf32, #tpu.memory_space<any>>
      %c0_i32_25 = arith.constant 0 : i32
      %c0_i32_26 = arith.constant 0 : i32
      %28 = tpu.memref_slice %arg8[%c2_i32_22, %c0_i32_25, %c0_i32_26] : memref<4x2x128xf32, #tpu.memory_space<vmem>> -> memref<1x2x128xf32, #tpu.memory_space<vmem>>
      %29 = tpu.memref_squeeze %28 : memref<1x2x128xf32, #tpu.memory_space<vmem>> -> memref<2x128xf32, #tpu.memory_space<vmem>>
      %30 = tpu.memref_slice %arg9[%c2_i32_23] : memref<4x!tpu.dma_semaphore, #tpu.memory_space<semaphore_mem>> -> memref<1x!tpu.dma_semaphore, #tpu.memory_space<semaphore_mem>>
      %31 = tpu.memref_squeeze %30 : memref<1x!tpu.dma_semaphore, #tpu.memory_space<semaphore_mem>> -> memref<!tpu.dma_semaphore, #tpu.memory_space<semaphore_mem>>
      tpu.enqueue_dma source(%27 : memref<2x128xf32, #tpu.memory_space<any>>) target(%29 : memref<2x128xf32, #tpu.memory_space<vmem>>) target_semaphore(%31 : memref<!tpu.dma_semaphore, #tpu.memory_space<semaphore_mem>>)
    } else {
    }
    %c0_4 = arith.constant 0 : index
    %c0_5 = arith.constant 0 : index
    %12 = vector.load %arg4[%c0_4, %c0_5] : memref<2x128xf32, #tpu.memory_space<vmem>>, vector<2x128xf32>
    %c0_6 = arith.constant 0 : index
    %c0_7 = arith.constant 0 : index
    %13 = vector.load %arg6[%c0_6, %c0_7] : memref<2x128xf32, #tpu.memory_space<vmem>>, vector<2x128xf32>
    tpu.vector_store %arg6[%c0_6, %c0_7], %12 {strides = array<i32>} : memref<2x128xf32, #tpu.memory_space<vmem>>, vector<2x128xf32>,
    %c0_i32_8 = arith.constant 0 : i32
    %14 = arith.subi %2, %c0_i32_8 : i32
    %c1_i32_9 = arith.constant 1 : i32
    %c1_i32_10 = arith.constant 1 : i32
    %15 = arith.subi %c1_i32_9, %c1_i32_10 : i32
    %16 = arith.addi %14, %15 : i32
    %c1_i32_11 = arith.constant 1 : i32
    %17 = arith.divsi %16, %c1_i32_11 : i32
    %c1_i32_12 = arith.constant 1 : i32
    %c0_i32_13 = arith.constant 0 : i32
    %c0_i32_14 = arith.constant 0 : i32
    %18 = arith.subi %17, %c0_i32_14 : i32
    %19 = arith.addi %c0_i32_14, %18 : i32
    %c1_i32_15 = arith.constant 1 : i32
    scf.for %arg10 = %c0_i32_14 to %19 step %c1_i32_15  : i32 {
      %25 = arith.muli %arg10, %c1_i32_12 : i32
      %26 = arith.addi %c0_i32_13, %25 : i32
      %c3_i32 = arith.constant 3 : i32
      %27 = arith.addi %26, %c3_i32 : i32
      %28 = arith.cmpi slt, %27, %2 : i32
      %29 = arith.extui %28 : i1 to i32
      %c0_i32_22 = arith.constant 0 : i32
      %30 = arith.cmpi ne, %29, %c0_i32_22 : i32
      scf.if %30 {
        %c4_i32_37 = arith.constant 4 : i32
        %c0_i32_38 = arith.constant 0 : i32
        %55 = arith.cmpi eq, %c4_i32_37, %c0_i32_38 : i32
        %c1_i32_39 = arith.constant 1 : i32
        %56 = arith.select %55, %c1_i32_39, %c4_i32_37 : i32
        %57 = arith.remsi %27, %56 : i32
        %c0_i32_40 = arith.constant 0 : i32
        %58 = arith.cmpi ne, %57, %c0_i32_40 : i32
        %c0_i32_41 = arith.constant 0 : i32
        %59 = arith.cmpi slt, %57, %c0_i32_41 : i32
        %c0_i32_42 = arith.constant 0 : i32
        %60 = arith.cmpi slt, %56, %c0_i32_42 : i32
        %61 = arith.xori %59, %60 : i1
        %62 = arith.andi %61, %58 : i1
        %63 = arith.addi %57, %56 : i32
        %64 = arith.select %62, %63, %57 : i32
        %65 = arith.index_cast %27 : i32 to index
        %66 = memref.load %arg1[%65] : memref<16xi32, #tpu.memory_space<smem>>
        %c0_i32_43 = arith.constant 0 : i32
        %67 = tpu.memref_slice %arg3[%66, %1, %c0_i32_43] : memref<256x2x128xf32, #tpu.memory_space<any>> -> memref<1x2x128xf32, #tpu.memory_space<any>>
        %68 = tpu.memref_squeeze %67 : memref<1x2x128xf32, #tpu.memory_space<any>> -> memref<2x128xf32, #tpu.memory_space<any>>
        %c0_i32_44 = arith.constant 0 : i32
        %c0_i32_45 = arith.constant 0 : i32
        %69 = tpu.memref_slice %arg8[%64, %c0_i32_44, %c0_i32_45] : memref<4x2x128xf32, #tpu.memory_space<vmem>> -> memref<1x2x128xf32, #tpu.memory_space<vmem>>
        %70 = tpu.memref_squeeze %69 : memref<1x2x128xf32, #tpu.memory_space<vmem>> -> memref<2x128xf32, #tpu.memory_space<vmem>>
        %71 = tpu.memref_slice %arg9[%64] : memref<4x!tpu.dma_semaphore, #tpu.memory_space<semaphore_mem>> -> memref<1x!tpu.dma_semaphore, #tpu.memory_space<semaphore_mem>>
        %72 = tpu.memref_squeeze %71 : memref<1x!tpu.dma_semaphore, #tpu.memory_space<semaphore_mem>> -> memref<!tpu.dma_semaphore, #tpu.memory_space<semaphore_mem>>
        tpu.enqueue_dma source(%68 : memref<2x128xf32, #tpu.memory_space<any>>) target(%70 : memref<2x128xf32, #tpu.memory_space<vmem>>) target_semaphore(%72 : memref<!tpu.dma_semaphore, #tpu.memory_space<semaphore_mem>>)
      } else {
      }
      %c4_i32 = arith.constant 4 : i32
      %c0_i32_23 = arith.constant 0 : i32
      %31 = arith.cmpi eq, %c4_i32, %c0_i32_23 : i32
      %c1_i32_24 = arith.constant 1 : i32
      %32 = arith.select %31, %c1_i32_24, %c4_i32 : i32
      %33 = arith.remsi %26, %32 : i32
      %c0_i32_25 = arith.constant 0 : i32
      %34 = arith.cmpi ne, %33, %c0_i32_25 : i32
      %c0_i32_26 = arith.constant 0 : i32
      %35 = arith.cmpi slt, %33, %c0_i32_26 : i32
      %c0_i32_27 = arith.constant 0 : i32
      %36 = arith.cmpi slt, %32, %c0_i32_27 : i32
      %37 = arith.xori %35, %36 : i1
      %38 = arith.andi %37, %34 : i1
      %39 = arith.addi %33, %32 : i32
      %40 = arith.select %38, %39, %33 : i32
      %41 = arith.index_cast %26 : i32 to index
      %42 = memref.load %arg1[%41] : memref<16xi32, #tpu.memory_space<smem>>
      %c0_i32_28 = arith.constant 0 : i32
      %43 = tpu.memref_slice %arg3[%42, %1, %c0_i32_28] : memref<256x2x128xf32, #tpu.memory_space<any>> -> memref<1x2x128xf32, #tpu.memory_space<any>>
      %44 = tpu.memref_squeeze %43 : memref<1x2x128xf32, #tpu.memory_space<any>> -> memref<2x128xf32, #tpu.memory_space<any>>
      %c0_i32_29 = arith.constant 0 : i32
      %c0_i32_30 = arith.constant 0 : i32
      %45 = tpu.memref_slice %arg8[%40, %c0_i32_29, %c0_i32_30] : memref<4x2x128xf32, #tpu.memory_space<vmem>> -> memref<1x2x128xf32, #tpu.memory_space<vmem>>
      %46 = tpu.memref_squeeze %45 : memref<1x2x128xf32, #tpu.memory_space<vmem>> -> memref<2x128xf32, #tpu.memory_space<vmem>>
      %47 = tpu.memref_slice %arg9[%40] : memref<4x!tpu.dma_semaphore, #tpu.memory_space<semaphore_mem>> -> memref<1x!tpu.dma_semaphore, #tpu.memory_space<semaphore_mem>>
      %48 = tpu.memref_squeeze %47 : memref<1x!tpu.dma_semaphore, #tpu.memory_space<semaphore_mem>> -> memref<!tpu.dma_semaphore, #tpu.memory_space<semaphore_mem>>
      tpu.wait_dma2 semaphore(%48 : memref<!tpu.dma_semaphore, #tpu.memory_space<semaphore_mem>>) src(%44 : memref<2x128xf32, #tpu.memory_space<any>>) dst(%46 : memref<2x128xf32, #tpu.memory_space<vmem>>)
      %c0_31 = arith.constant 0 : index
      %c0_32 = arith.constant 0 : index
      %49 = vector.load %arg6[%c0_31, %c0_32] : memref<2x128xf32, #tpu.memory_space<vmem>>, vector<2x128xf32>
      %50 = arith.index_cast %40 : i32 to index
      %c0_33 = arith.constant 0 : index
      %c0_34 = arith.constant 0 : index
      %51 = vector.load %arg8[%50, %c0_33, %c0_34] : memref<4x2x128xf32, #tpu.memory_space<vmem>>, vector<1x2x128xf32>
      %52 = vector.shape_cast %51 : vector<1x2x128xf32> to vector<2x128xf32>
      %53 = arith.addf %49, %52 : vector<2x128xf32>
      %c0_35 = arith.constant 0 : index
      %c0_36 = arith.constant 0 : index
      %54 = vector.load %arg6[%c0_35, %c0_36] : memref<2x128xf32, #tpu.memory_space<vmem>>, vector<2x128xf32>
      tpu.vector_store %arg6[%c0_35, %c0_36], %53 {strides = array<i32>} : memref<2x128xf32, #tpu.memory_space<vmem>>, vector<2x128xf32>,
    }
    %c0_16 = arith.constant 0 : index
    %c0_17 = arith.constant 0 : index
    %20 = vector.load %arg5[%c0_16, %c0_17] : memref<2x128xf32, #tpu.memory_space<vmem>>, vector<2x128xf32>
    %c0_18 = arith.constant 0 : index
    %c0_19 = arith.constant 0 : index
    %21 = vector.load %arg6[%c0_18, %c0_19] : memref<2x128xf32, #tpu.memory_space<vmem>>, vector<2x128xf32>
    %22 = arith.mulf %20, %21 : vector<2x128xf32>
    %23 = arith.mulf %22, %22 : vector<2x128xf32>
    %c0_20 = arith.constant 0 : index
    %c0_21 = arith.constant 0 : index
    %24 = vector.load %arg7[%c0_20, %c0_21] : memref<2x128xf32, #tpu.memory_space<vmem>>, vector<2x128xf32>
    tpu.vector_store %arg7[%c0_20, %c0_21], %23 {strides = array<i32>} : memref<2x128xf32, #tpu.memory_space<vmem>>, vector<2x128xf32>,
    return
  }
  func.func @transform_1(%arg0: i32, %arg1: memref<16xi32, #tpu.memory_space<smem>>, %arg2: memref<1xi32, #tpu.memory_space<smem>>) -> (i32, i32) {
    %c0_i32 = arith.constant 0 : i32
    %c0_i32_0 = arith.constant 0 : i32
    return %arg0, %c0_i32 : i32, i32
  }
  func.func @transform_2(%arg0: i32, %arg1: memref<16xi32, #tpu.memory_space<smem>>, %arg2: memref<1xi32, #tpu.memory_space<smem>>) -> (i32, i32) {
    %c0_i32 = arith.constant 0 : i32
    %c0_i32_0 = arith.constant 0 : i32
    return %arg0, %c0_i32 : i32, i32
  }
  func.func @transform_3(%arg0: i32, %arg1: memref<16xi32, #tpu.memory_space<smem>>, %arg2: memref<1xi32, #tpu.memory_space<smem>>) -> (i32, i32) {
    %c0_i32 = arith.constant 0 : i32
    %c0_i32_0 = arith.constant 0 : i32
    return %arg0, %c0_i32 : i32, i32
  }
  func.func @transform_4(%arg0: i32, %arg1: memref<16xi32, #tpu.memory_space<smem>>, %arg2: memref<1xi32, #tpu.memory_space<smem>>) -> (i32, i32) {
    %c0_i32 = arith.constant 0 : i32
    %c0_i32_0 = arith.constant 0 : i32
    return %arg0, %c0_i32 : i32, i32
  }
}

</mosaic_0001>

<bundles_post_ra>
// kernel: tpu_custom_call.1
= control target key start
LH: loop header
LB: loop body
LE: loop exit
PB: predicated region body
PF: predicated region fallthrough
CT: control target
= control target key end

     0   :  { %s486_s24 = smov [#allocation5]   ;;  %s678_s0 = inlined_call_operand.hbm [shape: s32[16], index: 0, kind: input, shape index: {}]   ;;  %s679_s1 = inlined_call_operand.<no memory space> [shape: s32[1], index: 1, kind: input, shape index: {}]   ;;  %s680_s2 = inlined_call_operand.hbm [shape: f32[256,2,128], index: 2, kind: input, shape index: {}]   ;;  %s681_s3 = inlined_call_operand.vmem [shape: f32[2,128], index: 3, kind: input, shape index: {}]   ;;  %s682_s4 = inlined_call_operand.vmem [shape: f32[2,128], index: 4, kind: input, shape index: {}]   ;;  %s683_s5 = inlined_call_operand.hbm [shape: f32[2,128], index: 5, kind: output, shape index: {0}]   ;;  %s684_s6 = inlined_call_operand.hbm [shape: f32[2,128], index: 6, kind: output, shape index: {1}]  }
   0x1   :  { %s13_s23 = sshll.u32 %s678_s0, 4  ;;  %s14_s23 = int_to_ptr.hbm [resolvable:$true] %s13_s23 }
   0x2   :  { %16 = dma.hbm_to_smem %s14_s23, 16, %s486_s24, [#allocation4] }
   0x3   :  { %474 = dma.done.wait [#allocation4], 16 }
   0x4   :  { %475 = vsyncadd [#allocation4], 4294967280 }
   0x5   :  { %20 = sfence }
   0x6   :  { %21 = vsyncpa [#allocation8], 0 }
   0x7   :  { %22 = vsyncpa [#allocation10], 0  ;;  %p247_p0 = scmp.le.s32.totalorder %s679_s1, 0  ;;  %p280_p1 = scmp.gt.s32.totalorder %s679_s1, 0  ;;  %v96_v0 = vld [vmem:[%s681_s3] sm:$0x3] }
   0x8   :  { %s33_s0 = sld [smem:[#allocation5]]  ;;  %97 = vst [vmem:[#allocation7] sm:$0x3] %v96_v0  ;;  %s487_s7 = smov [#allocation2]  }
   0x9   :  { %s540_s8 = sshll.u32 %s487_s7, 4  ;;  %p281_p2 = scmp.gt.s32.totalorder %s679_s1, 1  ;;  %s47_s8 = int_to_ptr.vmem [resolvable:$true] %s540_s8 }
   0xa   :  { %s250_s11 = sld [smem:[#allocation5 + $0x1]]  ;;  %s488_s12 = smov [#allocation2 + $0x2]  }
   0xb   :  { %s546_s13 = sshll.u32 %s488_s12, 4  ;;  %p282_p3 = scmp.gt.s32.totalorder %s679_s1, 2  ;;  %s70_s13 = int_to_ptr.vmem [resolvable:$true] %s546_s13 }
   0xc   :  { %s253_s16 = sld [smem:[#allocation5 + $0x2]]  ;;  %s489_s21 = smov [#allocation2 + $0x4]  }
   0xd   :  { %s555_s22 = sshll.u32 %s489_s21, 4  ;;  %s564_s30 = scalar_lea.hbm %s680_s2, 512  ;;  %s93_s22 = int_to_ptr.vmem [resolvable:$true] %s555_s22 }
   0xe   :  { %s248_s3 = sshll.u32 %s33_s0, 1 }
   0xf   :  { %s36_s19 = scalar_lea.hbm %s680_s2, %s248_s3 }
  0x10   :  { %s44_s20 = sshll.u32 %s36_s19, 4  ;;  %s251_s23 = sshll.u32 %s250_s11, 1  ;;  %s45_s20 = int_to_ptr.hbm [resolvable:$true] %s44_s20 }
  0x11   :  { %s310_s24 = sshra.s32 %s45_s20, 4  ;;  %s311_s24 = int_to_ptr.hbm [resolvable:$true] %s310_s24 }
  0x12   :  { %s312_s25 = scalar_lea.hbm %s311_s24, 2  ;;  %p317_p7 = scmp.lt.s32.totalorder %s311_s24, %s680_s2 }
  0x13   :  { %p313_p4 = scmp.ne.s32.totalorder %s311_s24, %s312_s25  ;;  %p318_p8 = scmp.lt.s32.totalorder %s564_s30, %s312_s25 }
  0x15   :  { %p314_p5 = pnand %p313_p4, %p280_p1  ;;  %p319_p9 = por %p318_p8, %p317_p7 }
  0x17   :  { %p315_p6 = pneg %p314_p5 }
  0x19   :  { %p320_p10 = pnand %p319_p9, %p315_p6 }
  0x1b   :  { %323 = shalt.err (!%p320_p10)  }
  0x1c   :  { %271 = dma.hbm_to_vmem [thread:$0]  (%p280_p1), %s45_s20, 32, %s47_s8, [#allocation3] }
  0x1d   :  { %s57_s14 = scalar_lea.hbm %s680_s2, %s251_s23  ;;  %s254_s3 = sshll.u32 %s253_s16, 1 }
  0x1e   :  { %s67_s15 = sshll.u32 %s57_s14, 4  ;;  %s80_s19 = scalar_lea.hbm %s680_s2, %s254_s3  ;;  %s68_s15 = int_to_ptr.hbm [resolvable:$true] %s67_s15 }
  0x1f   :  { %s338_s21 = sshra.s32 %s68_s15, 4  ;;  %s339_s21 = int_to_ptr.hbm [resolvable:$true] %s338_s21 }
  0x20   :  { %s340_s24 = scalar_lea.hbm %s339_s21, 2  ;;  %p345_p1 = scmp.lt.s32.totalorder %s339_s21, %s680_s2 }
  0x21   :  { %p341_p11 = scmp.ne.s32.totalorder %s339_s21, %s340_s24  ;;  %p346_p4 = scmp.lt.s32.totalorder %s564_s30, %s340_s24 }
  0x23   :  { %p342_p12 = pnand %p341_p11, %p281_p2  ;;  %p347_p5 = por %p346_p4, %p345_p1 }
  0x25   :  { %p343_p13 = pneg %p342_p12 }
  0x27   :  { %p348_p6 = pnand %p347_p5, %p343_p13 }
  0x29   :  { %351 = shalt.err (!%p348_p6)  }
  0x2a   :  { %273 = dma.hbm_to_vmem [thread:$0]  (%p281_p2), %s68_s15, 32, %s70_s13, [#allocation3 + $0x1] }
  0x2b   :  { %s90_s27 = sshll.u32 %s80_s19, 4  ;;  %s91_s27 = int_to_ptr.hbm [resolvable:$true] %s90_s27 }
  0x2c   :  { %s366_s28 = sshra.s32 %s91_s27, 4  ;;  %s367_s28 = int_to_ptr.hbm [resolvable:$true] %s366_s28 }
  0x2d   :  { %s368_s29 = scalar_lea.hbm %s367_s28, 2  ;;  %p373_p10 = scmp.lt.s32.totalorder %s367_s28, %s680_s2 }
  0x2e   :  { %p369_p7 = scmp.ne.s32.totalorder %s367_s28, %s368_s29  ;;  %p374_p11 = scmp.lt.s32.totalorder %s564_s30, %s368_s29 }
  0x30   :  { %p370_p8 = pnand %p369_p7, %p282_p3  ;;  %p375_p12 = por %p374_p11, %p373_p10 }
  0x32   :  { %p371_p9 = pneg %p370_p8 }
  0x34   :  { %p376_p13 = pnand %p375_p12, %p371_p9 }
  0x36   :  { %379 = shalt.err (!%p376_p13)  }
  0x37   :  { %275 = dma.hbm_to_vmem [thread:$0]  (%p282_p3), %s91_s27, 32, %s93_s22, [#allocation3 + $0x2] }
  0x38   :  { %244 = sbr.rel (%p247_p0) target bundleno = 114 (0x72), region = 84  ;;  %s613_s15 = smov (!%p247_p0), 0  }
  0x3d LB: > { %s104_s3 = sadd.s32 3, %s484_s15  ;;  %s142_s24 = ssub.s32 0, %s484_s15  ;;  %s484_s15 = sphi %s613_s15, %s101_s15  }
  0x3e   : > { %p622_p2 = scmp.lt.s32.totalorder %s104_s3, %s679_s1  ;;  %p109_p0 = scmp.lt.s32.totalorder %s104_s3, 0 }
  0x3f   : > { %s110_s19 = ssub.s32 0, %s104_s3  ;;  %s262_s26 = smin.u32 %s484_s15, %s142_s24 }
  0x40   : > { %s257_s21 = smin.u32 %s110_s19, %s104_s3  ;;  %s144_s20 = sand.u32 3, %s262_s26  }
  0x41   : > { %s112_s25 = sand.u32 3, %s257_s21   ;;  %s689_s3 = smov (!%p622_p2, %s104_s3), 0 }
  0x42   : > { %s113_s8 = ssub.s32 0, %s112_s25  ;;  %p141_p1 = scmp.lt.s32.totalorder %s484_s15, 0 }
  0x43   : > { %s687_s8 = smov (!%p109_p0, %s113_s8), %s112_s25  ;;  %s145_s29 = ssub.s32 0, %s144_s20 }
  0x44   : > { %s277_s16 = scalar_select %p622_p2, [#allocation5], [#allocation21] }
  0x45   : > { %p259_p3 = scmp.lt.s32.totalorder %s687_s8, 0  ;;  %s119_s23 = sadd.s32 4, %s687_s8 }
  0x46   : > { %s121_s27 = sld [smem:[%s277_s16 + %s689_s3]]  ;;  %s693_s29 = smov (!%p141_p1, %s145_s29), %s144_s20 }
  0x47   : > { %s691_s23 = smov (!%p259_p3, %s119_s23), %s687_s8  ;;  %p264_p4 = scmp.lt.s32.totalorder %s693_s29, 0 }
  0x48   : > { %s261_s28 = sshll.u32 %s691_s23, 1  ;;  %s151_s14 = sadd.s32 4, %s693_s29 }
  0x49   : > { %s126_s0 = scalar_lea.vmem [#allocation2], %s261_s28  ;;  %s127_s3 = scalar_lea.sflag [#allocation3], %s691_s23 }
  0x4a   : > { %s137_s7 = sshll.u32 %s126_s0, 4  ;;  %s638_s7 = int_to_ptr.vmem [resolvable:$true] %s137_s7 }
  0x4c   : > { %s260_s9 = sshll.u32 %s121_s27, 1 }
  0x4d   : > { %s124_s11 = scalar_lea.hbm %s680_s2, %s260_s9 }
  0x4e   : > { %s135_s12 = sshll.u32 %s124_s11, 4  ;;  %s136_s12 = int_to_ptr.hbm [resolvable:$true] %s135_s12 }
  0x4f   : > { %s394_s17 = sshra.s32 %s136_s12, 4  ;;  %s395_s17 = int_to_ptr.hbm [resolvable:$true] %s394_s17 }
  0x50   : > { %s396_s18 = scalar_lea.hbm %s395_s17, 2  ;;  %p401_p8 = scmp.lt.s32.totalorder %s395_s17, %s680_s2 }
  0x51   : > { %p397_p5 = scmp.ne.s32.totalorder %s395_s17, %s396_s18  ;;  %p402_p9 = scmp.lt.s32.totalorder %s564_s30, %s396_s18 }
  0x53   : > { %p398_p6 = pnand %p397_p5, %p622_p2  ;;  %p403_p10 = por %p402_p9, %p401_p8 }
  0x55   : > { %p399_p7 = pneg %p398_p6 }
  0x57   : > { %p404_p11 = pnand %p403_p10, %p399_p7 }
  0x59   : > { %407 = shalt.err (!%p404_p11)  }
  0x5a   : > { %s408_s24 = sshra.s32 %s638_s7, 4  ;;  %s490_s26 = smov [#allocation2]   ;;  %s409_s24 = int_to_ptr.vmem [resolvable:$true] %s408_s24 }
  0x5b   : > { %s410_s25 = scalar_lea.vmem %s409_s24, 2  ;;  %s414_s8 = scalar_lea.vmem %s490_s26, 8 }
  0x5c   : > { %p411_p12 = scmp.ne.s32.totalorder %s409_s24, %s410_s25  ;;  %p415_p3 = scmp.lt.s32.totalorder %s409_s24, [#allocation2] }
  0x5d   : > { %p416_p1 = scmp.lt.s32.totalorder %s414_s8, %s410_s25 }
  0x5e   : > { %p412_p13 = pnand %p411_p12, %p622_p2 }
  0x5f   : > { %p417_p5 = por %p416_p1, %p415_p3 }
  0x60   : > { %p413_p0 = pneg %p412_p13 }
  0x62   : > { %p418_p6 = pnand %p417_p5, %p413_p0 }
  0x64   : > { %421 = shalt.err (!%p418_p6)  }
  0x65   : > { %279 = dma.hbm_to_vmem [thread:$0]  (%p622_p2), %s136_s12, 32, %s638_s7, %s127_s3 }
  0x66   : > { %s695_s14 = smov (!%p264_p4, %s151_s14), %s693_s29 }
  0x67   : > { %s265_s20 = sshll.u32 %s695_s14, 1  ;;  %s156_s23 = scalar_lea.sflag [#allocation3], %s695_s14 }
  0x68   : > { %s155_s16 = scalar_lea.vmem [#allocation2], %s265_s20 }
  0x69   : > { %476 = dma.done.wait %s156_s23, 32 }
  0x6a   : > { %477 = vsyncadd %s156_s23, 4294967264  ;;  %v160_v1 = vld [vmem:[#allocation7] sm:$0x3]  ;;  %v161_v2 = vld [vmem:[%s155_s16] sm:$0x3]  ;;  %s101_s15 = sadd.s32 1, %s484_s15  }
  0x6b   : > { %v162_v3 = vadd.f32 %v161_v2, %v160_v1  ;;  %p100_p7 = scmp.ge.s32.totalorder %s101_s15, %s679_s1 }
  0x6d   : > { %163 = vst [vmem:[#allocation7] sm:$0x3] %v162_v3  ;;  %103 = sbr.rel (!%p100_p7) target bundleno = 61 (0x3d), region = 90 }
  0x72 PF:  { %v164_v4 = vld [vmem:[%s682_s4] sm:$0x3]  ;;  %s176_s9 = sshll.u32 %s683_s5, 4  ;;  %s491_s10 = smov [#allocation7]   ;;  %s177_s9 = int_to_ptr.hbm [resolvable:$true] %s176_s9 }
  0x73   :  { %s174_s13 = sshll.u32 %s491_s10, 4  ;;  %s492_s11 = smov [#allocation9]   ;;  %s175_s13 = int_to_ptr.vmem [resolvable:$true] %s174_s13 }
  0x74   :  { %v165_v5 = vld [vmem:[#allocation7] sm:$0x3]  ;;  %179 = dma.vmem_to_hbm [thread:$0]  %s175_s13, 32, %s177_s9, [#allocation8]  }
  0x75   :  { %v166_v6 = vmul.f32 %v165_v5, %v164_v4  ;;  %s185_s15 = sshll.u32 %s492_s11, 4  ;;  %s187_s2 = sshll.u32 %s684_s6, 4  ;;  %s186_s15 = int_to_ptr.vmem [resolvable:$true] %s185_s15  ;;  %s188_s2 = int_to_ptr.hbm [resolvable:$true] %s187_s2 }
  0x77   :  { %v167_v7 = vmul.f32 %v166_v6, %v166_v6 }
  0x79   :  { %168 = vst [vmem:[#allocation9] sm:$0x3] %v167_v7 }
  0x7a   :  { %190 = dma.vmem_to_hbm [thread:$0]  %s186_s15, 32, %s188_s2, [#allocation10]  }
  0x7b   :  { %478 = dma.done.wait [#allocation8], 32  }
  0x7c   :  { %479 = vsyncadd [#allocation8], 4294967264 }
  0x7d   :  { %480 = dma.done.wait [#allocation10], 32  }
  0x7e   :  { %481 = vsyncadd [#allocation10], 4294967264 }
  0x7f   :  { %199 = vsyncpa [#allocation8], 1 }
  0x80   :  { %200 = vsyncpa [#allocation10], 1 }
  0x81   :  { %201 = vsyncmov [#allocation3] }
  0x84   :  { %s202_s4 = vpop.sfrf %201 }
  0x85   :  { %p266_p2 = scmp.ne.s32.totalorder %s202_s4, 0 }
  0x87   :  { %206 = shalt.err (%p266_p2)  }
  0x88   :  { %208 = vsyncmov [#allocation3 + $0x1] }
  0x8b   :  { %s209_s5 = vpop.sfrf %208 }
  0x8c   :  { %p267_p4 = scmp.ne.s32.totalorder %s209_s5, 0 }
  0x8e   :  { %213 = shalt.err (%p267_p4)  }
  0x8f   :  { %215 = vsyncmov [#allocation3 + $0x2] }
  0x92   :  { %s216_s6 = vpop.sfrf %215 }
  0x93   :  { %p268_p8 = scmp.ne.s32.totalorder %s216_s6, 0 }
  0x95   :  { %220 = shalt.err (%p268_p8)  }
  0x96   :  { %222 = vsyncmov [#allocation3 + $0x3] }
  0x99   :  { %s223_s30 = vpop.sfrf %222 }
  0x9a   :  { %p269_p9 = scmp.ne.s32.totalorder %s223_s30, 0 }
  0x9c   :  { %227 = shalt.err (%p269_p9)  }

</bundles_post_ra>
